<compile_context>
chip_gen: v7x
topology: tpu7x:2x2x1
jax: 0.10.0
libtpu: 0.0.40
codegen_flags: <defaults>
</compile_context>

<pallas_src>
import jax
import jax.numpy as jnp
from jax import lax
from jax.experimental import pallas as pl
from jax.experimental.pallas import tpu as pltpu


def _round_up(x, m):
    return ((x + m - 1) // m) * m


# --------------------------------------------------------------------------
# Pass 1: degrees -> norm, pre-normalized features
# --------------------------------------------------------------------------
def _degree_feat_kernel(a_ref, h_ref, norm_ref, feat_ref, dsum_ref):
    k = pl.program_id(1)

    @pl.when(k == 0)
    def _():
        dsum_ref[...] = jnp.zeros_like(dsum_ref)

    # a tile is bf16 (exact for a 0/1 adjacency); reduce in f32.
    dsum_ref[...] += jnp.sum(a_ref[...].astype(jnp.float32), axis=-1,
                             keepdims=True)

    @pl.when(k == pl.num_programs(1) - 1)
    def _():
        # clamp(min=1) then d ** -0.5 ; elementwise math kept in f32
        norm = lax.rsqrt(jnp.maximum(dsum_ref[...], 1.0))      # (tile, 1)
        norm_ref[...] = norm
        feat_ref[...] = (h_ref[...] * norm).astype(feat_ref.dtype)


# --------------------------------------------------------------------------
# Pass 2: tiled  out[i] = ((sum_k a[i,k] @ feat[k]) @ W) * norm[i]
# --------------------------------------------------------------------------
def _gcn_matmul_kernel(a_ref, feat_ref, w_ref, norm_ref, o_ref, acc_ref):
    k = pl.program_id(1)

    @pl.when(k == 0)
    def _():
        acc_ref[...] = jnp.zeros_like(acc_ref)

    # bf16 x bf16 on the MXU, f32 accumulation.
    acc_ref[...] += jnp.dot(a_ref[...], feat_ref[...],
                            preferred_element_type=jnp.float32)

    @pl.when(k == pl.num_programs(1) - 1)
    def _():
        out = jnp.dot(acc_ref[...], w_ref[...],
                      preferred_element_type=jnp.float32)
        o_ref[...] = (out * norm_ref[...]).astype(o_ref.dtype)
        # TODO(synk): optional `activation` callable is None by default; if
        # needed, apply it here (e.g. jnp.maximum(..., 0) for ReLU).


# --------------------------------------------------------------------------
# Wrapper
# --------------------------------------------------------------------------
def gcn_forward(a, h, weight, *, tile=256):
    """a: (N, N) dense adjacency, h: (N, F_in), weight: (F_out, F_in) (torch
    Linear layout). Returns (N, F_out) float32."""
    n = a.shape[0]
    f_in = h.shape[1]
    f_out = weight.shape[0]

    n_p = _round_up(n, tile)
    f_in_p = _round_up(f_in, 128)     # lane-dense intermediate
    f_out_p = _round_up(f_out, 128)   # lane-dense output (unmasked stores)

    # Pad + cast in the wrapper (tiny XLA ops). bf16 is exact for binary `a`;
    # zero-padded rows get degree 0 -> clamped to 1 -> harmless, sliced off.
    a_p = jnp.pad(a.astype(jnp.bfloat16), ((0, n_p - n), (0, n_p - n)))
    h_p = jnp.pad(h.astype(jnp.float32), ((0, n_p - n), (0, f_in_p - f_in)))
    w_p = jnp.pad(weight.T.astype(jnp.float32),
                  ((0, f_in_p - f_in), (0, f_out_p - f_out)))
    # TODO(synk): when F_out < F_in it is cheaper to pre-apply W in pass 1 so
    # the N^2 matmul contracts over F_out instead; shapes here have F_in<F_out.

    grid = (n_p // tile, n_p // tile)
    cparams = pltpu.CompilerParams(
        dimension_semantics=("parallel", "arbitrary"),
        vmem_limit_bytes=32 * 1024 * 1024)

    # ---- pass 1: norm + pre-normalized features ----
    norm, feat = pl.pallas_call(
        _degree_feat_kernel,
        out_shape=(jax.ShapeDtypeStruct((n_p, 1), jnp.float32),
                   jax.ShapeDtypeStruct((n_p, f_in_p), jnp.bfloat16)),
        grid_spec=pltpu.PrefetchScalarGridSpec(
            num_scalar_prefetch=0,
            grid=grid,
            in_specs=[
                pl.BlockSpec((tile, tile), lambda i, k: (i, k)),
                pl.BlockSpec((tile, f_in_p), lambda i, k: (i, 0)),
            ],
            out_specs=[
                pl.BlockSpec((tile, 1), lambda i, k: (i, 0)),
                pl.BlockSpec((tile, f_in_p), lambda i, k: (i, 0)),
            ],
            scratch_shapes=[pltpu.VMEM((tile, 1), jnp.float32)],
        ),
        compiler_params=cparams,
        cost_estimate=pl.CostEstimate(
            flops=n_p * n_p + 2 * n_p * f_in_p,
            transcendentals=n_p,
            bytes_accessed=(n_p * n_p * 2 + n_p * f_in_p * 4
                            + n_p * f_in_p * 2 + n_p * 4)),
    )(a_p, h_p)

    # ---- pass 2: tiled a @ feat, finalize with @W and post-norm ----
    out_p = pl.pallas_call(
        _gcn_matmul_kernel,
        out_shape=jax.ShapeDtypeStruct((n_p, f_out_p), jnp.float32),
        grid_spec=pltpu.PrefetchScalarGridSpec(
            num_scalar_prefetch=0,
            grid=grid,
            in_specs=[
                pl.BlockSpec((tile, tile), lambda i, k: (i, k)),
                pl.BlockSpec((tile, f_in_p), lambda i, k: (k, 0)),
                pl.BlockSpec((f_in_p, f_out_p), lambda i, k: (0, 0)),
                pl.BlockSpec((tile, 1), lambda i, k: (i, 0)),
            ],
            out_specs=pl.BlockSpec((tile, f_out_p), lambda i, k: (i, 0)),
            scratch_shapes=[pltpu.VMEM((tile, f_in_p), jnp.float32)],
        ),
        compiler_params=cparams,
        cost_estimate=pl.CostEstimate(
            flops=2 * n_p * n_p * f_in_p + 2 * n_p * f_in_p * f_out_p,
            transcendentals=0,
            bytes_accessed=(n_p * n_p * 2 + n_p * f_in_p * 2
                            + f_in_p * f_out_p * 4 + n_p * 4
                            + n_p * f_out_p * 4)),
    )(a_p, feat, w_p, norm)

    return out_p[:n, :f_out]


# --------------------------------------------------------------------------
# Reference + test
# --------------------------------------------------------------------------
def _xavier_uniform(key, fan_out, fan_in, gain=1.0):
    # Matches torch.nn.init.xavier_uniform_ for a (fan_out, fan_in) weight.
    bound = gain * (6.0 / (fan_in + fan_out)) ** 0.5
    return jax.random.uniform(key, (fan_out, fan_in), jnp.float32,
                              minval=-bound, maxval=bound)


def _reference(a, h, weight):
    d = jnp.maximum(jnp.sum(a, axis=-1), 1.0)
    norm = (d ** -0.5)[:, None]
    hh = h * norm
    hh = hh @ weight.T
    hh = a @ hh
    return hh * norm


if __name__ == "__main__":
    N, F_IN, F_OUT = 256, 16, 32

    key = jax.random.PRNGKey(0)
    k_a, k_h, k_w = jax.random.split(key, 3)

    # Binary dense adjacency, deterministic.
    a = jax.random.bernoulli(k_a, p=0.2, shape=(N, N)).astype(jnp.float32)
    h = jax.random.normal(k_h, (N, F_IN), dtype=jnp.float32)
    weight = _xavier_uniform(k_w, F_OUT, F_IN)   # torch Linear weight layout

    out = gcn_forward(a, h, weight, tile=128)    # grid (2, 2) at this size
    out = jax.block_until_ready(out)

    ref = _reference(a, h, weight)
    assert out.shape == (N, F_OUT)
    # bf16 MXU feed (adjacency cast exact; features rounded) -> loosened tol.
    assert jnp.allclose(out, ref, atol=3e-2, rtol=3e-2)

    print("KERNEL_OK")
</pallas_src>

<mosaic_0001>
module attributes {stable_mosaic.version = 11 : i64} {
  func.func @_degree_feat_kernel(%arg0: i32, %arg1: i32, %arg2: memref<128x128xbf16, #tpu.memory_space<vmem>>, %arg3: memref<128x128xf32, #tpu.memory_space<vmem>>, %arg4: memref<128x1xf32, #tpu.memory_space<vmem>>, %arg5: memref<128x128xbf16, #tpu.memory_space<vmem>>, %arg6: memref<128x1xf32, #tpu.memory_space<vmem>>) attributes {dimension_semantics = [#tpu.dimension_semantics<parallel>, #tpu.dimension_semantics<arbitrary>], iteration_bounds = array<i64: 2, 2>, scalar_prefetch = 0 : i64, scratch_operands = 1 : i64, tpu.core_type = #tpu.core_type<tc>, window_params = [{transform_indices = @transform_0, window_bounds = array<i64: 128, 128>}, {transform_indices = @transform_1, window_bounds = array<i64: 128, 128>}, {transform_indices = @transform_2, window_bounds = array<i64: 128, 1>}, {transform_indices = @transform_3, window_bounds = array<i64: 128, 128>}]} {
    %c0_i32 = arith.constant 0 : i32
    %0 = arith.cmpi eq, %arg1, %c0_i32 : i32
    %1 = arith.extui %0 : i1 to i32
    %c0_i32_0 = arith.constant 0 : i32
    %2 = arith.cmpi ne, %1, %c0_i32_0 : i32
    scf.if %2 {
      %cst_7 = arith.constant 0.000000e+00 : f32
      %13 = vector.broadcast %cst_7 : f32 to vector<128x1xf32>
      %c0_8 = arith.constant 0 : index
      %c0_9 = arith.constant 0 : index
      %14 = vector.load %arg6[%c0_8, %c0_9] : memref<128x1xf32, #tpu.memory_space<vmem>>, vector<128x1xf32>
      tpu.vector_store %arg6[%c0_8, %c0_9], %13 {strides = array<i32>} : memref<128x1xf32, #tpu.memory_space<vmem>>, vector<128x1xf32>,
    } else {
    }
    %c0 = arith.constant 0 : index
    %c0_1 = arith.constant 0 : index
    %3 = vector.load %arg6[%c0, %c0_1] : memref<128x1xf32, #tpu.memory_space<vmem>>, vector<128x1xf32>
    %c0_2 = arith.constant 0 : index
    %c0_3 = arith.constant 0 : index
    %4 = vector.load %arg2[%c0_2, %c0_3] : memref<128x128xbf16, #tpu.memory_space<vmem>>, vector<128x128xbf16>
    %5 = arith.extf %4 : vector<128x128xbf16> to vector<128x128xf32>
    %cst = arith.constant dense<0.000000e+00> : vector<128xf32>
    %6 = vector.multi_reduction <add>, %5, %cst [1] : vector<128x128xf32> to vector<128xf32>
    %7 = vector.shape_cast %6 : vector<128xf32> to vector<128x1xf32>
    %8 = arith.addf %3, %7 : vector<128x1xf32>
    %c0_4 = arith.constant 0 : index
    %c0_5 = arith.constant 0 : index
    %9 = vector.load %arg6[%c0_4, %c0_5] : memref<128x1xf32, #tpu.memory_space<vmem>>, vector<128x1xf32>
    tpu.vector_store %arg6[%c0_4, %c0_5], %8 {strides = array<i32>} : memref<128x1xf32, #tpu.memory_space<vmem>>, vector<128x1xf32>,
    %c1_i32 = arith.constant 1 : i32
    %10 = arith.cmpi eq, %arg1, %c1_i32 : i32
    %11 = arith.extui %10 : i1 to i32
    %c0_i32_6 = arith.constant 0 : i32
    %12 = arith.cmpi ne, %11, %c0_i32_6 : i32
    scf.if %12 {
      %c0_7 = arith.constant 0 : index
      %c0_8 = arith.constant 0 : index
      %13 = vector.load %arg6[%c0_7, %c0_8] : memref<128x1xf32, #tpu.memory_space<vmem>>, vector<128x1xf32>
      %cst_9 = arith.constant 1.000000e+00 : f32
      %14 = vector.broadcast %cst_9 : f32 to vector<128x1xf32>
      %15 = arith.maximumf %13, %14 : vector<128x1xf32>
      %16 = math.rsqrt %15 : vector<128x1xf32>
      %c0_10 = arith.constant 0 : index
      %c0_11 = arith.constant 0 : index
      %17 = vector.load %arg4[%c0_10, %c0_11] : memref<128x1xf32, #tpu.memory_space<vmem>>, vector<128x1xf32>
      tpu.vector_store %arg4[%c0_10, %c0_11], %16 {strides = array<i32>} : memref<128x1xf32, #tpu.memory_space<vmem>>, vector<128x1xf32>,
      %c0_12 = arith.constant 0 : index
      %c0_13 = arith.constant 0 : index
      %18 = vector.load %arg3[%c0_12, %c0_13] : memref<128x128xf32, #tpu.memory_space<vmem>>, vector<128x128xf32>
      %19 = vector.broadcast %16 : vector<128x1xf32> to vector<128x128xf32>
      %20 = arith.mulf %18, %19 : vector<128x128xf32>
      %21 = arith.truncf %20 : vector<128x128xf32> to vector<128x128xbf16>
      %c0_14 = arith.constant 0 : index
      %c0_15 = arith.constant 0 : index
      %22 = vector.load %arg5[%c0_14, %c0_15] : memref<128x128xbf16, #tpu.memory_space<vmem>>, vector<128x128xbf16>
      tpu.vector_store %arg5[%c0_14, %c0_15], %21 {strides = array<i32>} : memref<128x128xbf16, #tpu.memory_space<vmem>>, vector<128x128xbf16>,
    } else {
    }
    return
  }
  func.func @transform_0(%arg0: i32, %arg1: i32) -> (i32, i32) {
    %c0_i32 = arith.constant 0 : i32
    return %arg0, %arg1 : i32, i32
  }
  func.func @transform_1(%arg0: i32, %arg1: i32) -> (i32, i32) {
    %c0_i32 = arith.constant 0 : i32
    %c0_i32_0 = arith.constant 0 : i32
    return %arg0, %c0_i32 : i32, i32
  }
  func.func @transform_2(%arg0: i32, %arg1: i32) -> (i32, i32) {
    %c0_i32 = arith.constant 0 : i32
    %c0_i32_0 = arith.constant 0 : i32
    return %arg0, %c0_i32 : i32, i32
  }
  func.func @transform_3(%arg0: i32, %arg1: i32) -> (i32, i32) {
    %c0_i32 = arith.constant 0 : i32
    %c0_i32_0 = arith.constant 0 : i32
    return %arg0, %c0_i32 : i32, i32
  }
}

</mosaic_0001>

<bundles_post_ra>
// kernel: tpu_custom_call.1
= control target key start
LH: loop header
LB: loop body
LE: loop exit
PB: predicated region body
PF: predicated region fallthrough
CT: control target
= control target key end

     0   :  { %s1742_s0 = inlined_call_operand.hbm [shape: bf16[256,256], index: 0, kind: input, shape index: {}]   ;;  %s1743_s1 = inlined_call_operand.hbm [shape: f32[256,128], index: 1, kind: input, shape index: {}]   ;;  %s1744_s2 = inlined_call_operand.vmem [shape: f32[256,1], index: 2, kind: output, shape index: {0}]   ;;  %s1745_s3 = inlined_call_operand.hbm [shape: bf16[256,128], index: 3, kind: output, shape index: {1}]  }
   0x1   :  { %1754 = sst [smem:[#allocation13_spill]] %s1742_s0 }
   0x2   :  { %1755 = sst [smem:[#allocation14_spill]] %s1745_s3 }
   0x3   :  { %9 = vsyncpa [#allocation4], 0 }
   0x4   :  { %11 = vsyncpa [#allocation4 + $0x1], 0 }
   0x5   :  { %12 = vsyncpa [#allocation7], 0 }
   0x6   :  { %14 = vsyncpa [#allocation7 + $0x1], 0 }
   0x7   :  { %15 = vsyncpa [#allocation5], 0 }
   0x8   :  { %17 = vsyncpa [#allocation5 + $0x1], 0  ;;  %s1326_s12 = smov 0   ;;  %s1328_s13 = smov 0  }
   0x9   :  { %s1330_s14 = smov 0   ;;  %s1332_s15 = smov 0  }
   0xa   :  { %s1334_s16 = smov 0   ;;  %s1336_s17 = smov 0  }
   0xb   :  { %s1338_s18 = smov 0   ;;  %s1340_s19 = smov 0  }
   0xc   :  { %s1342_s20 = smov 0   ;;  %s1344_s21 = smov 0  }
   0xd   :  { %s1346_s22 = smov 0  }
   0xe LB: > { %s32_s23 = sadd.s32 1, %s1285_s20  ;;  %s35_s24 = sadd.s32 1, %s1289_s21  ;;  %s1293_s22 = sphi %s1346_s22, %s23_s22   ;;  %s1289_s21 = sphi %s1344_s21, %s1786_s21   ;;  %s1285_s20 = sphi %s1342_s20, %s1785_s20   ;;  %s1281_s19 = sphi %s1340_s19, %s1784_s19   ;;  %s1277_s18 = sphi %s1338_s18, %s1783_s18   ;;  %s1273_s17 = sphi %s1336_s17, %s1782_s17   ;;  %s1269_s16 = sphi %s1334_s16, %s1781_s16   ;;  %s1265_s15 = sphi %s1332_s15, %s1780_s15   ;;  %s1261_s14 = sphi %s1330_s14, %s1779_s14   ;;  %s1257_s13 = sphi %s1328_s13, %s1778_s13   ;;  %s1253_s12 = sphi %s1326_s12, %s1777_s12  }
   0xf   : > { %p33_p0 = scmp.ge.s32.totalorder %s32_s23, 2  ;;  %s44_s25 = sadd.s32 1, %s1273_s17 }
  0x10   : > { %p51_p1 = scmp.ne.s32.totalorder %s1273_s17, %s1269_s16  ;;  %p1749_p2 = scmp.eq.s32.totalorder %s1293_s22, 0 }
  0x11   : > { %s1788_s23 = smov (%p33_p0, %s32_s23), 0  ;;  %s1790_s24 = smov (!%p33_p0, %s35_s24), %s1289_s21 }
  0x12   : > { %1756 = sst [smem:[#allocation12_spill]] %s1788_s23  ;;  %s40_s26 = ssub.s32 %s1285_s20, %s1788_s23 }
  0x13   : > { %p1394_p3 = por %p1749_p2, %p51_p1  ;;  %p37_p4 = scmp.ge.s32.totalorder %s1790_s24, 2 }
  0x14   : > { %p1748_p6 = scmp.lt.s32.totalorder %s1293_s22, 4  ;;  %s159_s28 = sand.u32 1, %s1273_s17  }
  0x15   : > { %s1792_s24 = smov (%p37_p4, %s1790_s24), 0  ;;  %s853_s29 = sshll.u32 %s1289_s21, 5 }
  0x16   : > { %s1407_s30 = ssub.s32 %s1289_s21, %s1792_s24  ;;  %s817_s5 = sshll.u32 %s159_s28, 6 }
  0x17   : > { %s41_s4 = sor.u32 %s40_s26, %s1407_s30  ;;  %s169_s6 = sadd.s32 %s1285_s20, %s853_s29 }
  0x18   : > { %p42_p8 = scmp.eq.s32.totalorder %s41_s4, 0  ;;  %s820_s8 = sshll.u32 %s169_s6, 6 }
  0x19   : > { %s163_s9 = scalar_lea.vmem [#allocation3], %s817_s5  ;;  %s1758_s0 = sld [smem:[#allocation13_spill]] }
  0x1a   : > { %s1413_s7 = scalar_select %p42_p8, %s1273_s17, %s44_s25  }
  0x1b   : > { %s172_s10 = sshll.u32 %s163_s9, 4  ;;  %p1426_p9 = pnand %p1748_p6, %p1394_p3  ;;  %s1420_s10 = int_to_ptr.vmem [resolvable:$true] %s172_s10 }
  0x1c   : > { %p824_p10 = scmp.ge.s32.totalorder %s1293_s22, 1  ;;  %s1431_s25 = scalar_lea.sflag [#allocation4], %s159_s28 }
  0x1d   : > { %p1109_p12 = pneg %p1426_p9 }
  0x1f   : > { %s1418_s3 = scalar_lea.hbm %s1758_s0, %s820_s8  ;;  %s1112_s4 = scalar_lea.hbm %s1758_s0, 4096 }
  0x20   : > { %s1107_s23 = scalar_lea.hbm %s1418_s3, 1024  ;;  %p1113_p1 = scmp.lt.u32.totalorder %s1418_s3, %s1758_s0 }
  0x21   : > { %p1108_p11 = scmp.ne.s32.totalorder %s1418_s3, %s1107_s23  ;;  %p1114_p3 = scmp.lt.u32.totalorder %s1112_s4, %s1107_s23 }
  0x22   : > { %p1116_p8 = scmp.lt.u32.totalorder %s1107_s23, %s1418_s3 }
  0x23   : > { %p1110_p13 = pnand %p1109_p12, %p1108_p11  ;;  %p1115_p4 = por %p1114_p3, %p1113_p1 }
  0x25   : > { %p1111_p0 = pneg %p1110_p13  ;;  %p1117_p6 = por %p1116_p8, %p1115_p4 }
  0x27   : > { %p1118_p2 = pnand %p1117_p6, %p1111_p0 }
  0x29   : > { %1121 = shalt.err (!%p1118_p2)
}
  0x2a   : > { %s1122_s28 = scalar_lea.vmem %s1420_s10, 1024  ;;  %s1295_s8 = smov [#allocation3]  }
  0x2b   : > { %p1123_p11 = scmp.ne.s32.totalorder %s1420_s10, %s1122_s28  ;;  %s1127_s9 = sshll.u32 %s1295_s8, 4  ;;  %s1128_s9 = int_to_ptr.vmem [resolvable:$false] %s1127_s9 }
  0x2c   : > { %s1129_s11 = scalar_lea.vmem %s1128_s9, 2048  ;;  %p1130_p7 = scmp.lt.s32.totalorder %s1420_s10, %s1128_s9 }
  0x2d   : > { %p1125_p13 = pnand %p1123_p11, %p1109_p12  ;;  %p1131_p1 = scmp.lt.s32.totalorder %s1129_s11, %s1122_s28 }
  0x2f   : > { %p1126_p5 = pneg %p1125_p13  ;;  %p1132_p3 = por %p1131_p1, %p1130_p7 }
  0x31   : > { %p1133_p4 = pnand %p1132_p3, %p1126_p5 }
  0x33   : > { %1136 = shalt.err (!%p1133_p4)
}
  0x34   : > { %s1750_s23 = smov 128   ;;  %s1297_s29 = smov 64  }
  0x35   : > { %s1298_s27 = smov 4   ;;  %p201_p2 = scmp.lt.s32.totalorder %s1293_s22, 5 }
  0x36   : > { %967 = dma.hbm_to_vmem [thread:$0]  (!%p1426_p9), %s1418_s3, 1024, %s1420_s10, %s1431_s25, %s1750_s23, %s1297_s29, %s1298_s27  }
  0x37   : > { %p1463_p5 = pnand %p824_p10, %p201_p2  ;;  %s813_s5 = sadd.s32 4294967295, %s1293_s22  }
  0x38   : > { %s814_s6 = sadd.s32 4294967294, %s1293_s22   ;;  %p58_p6 = scmp.eq.s32.totalorder %s813_s5, 0 }
  0x39   : > { %s70_s28 = sadd.s32 1, %s1261_s14  ;;  %p1761_p7 = scmp.eq.s32.totalorder %s1407_s30, 0 }
  0x3a   : > { %p1762_p12 = scmp.ne.s32.totalorder %s1269_s16, %s1265_s15  ;;  %p77_p9 = scmp.ne.s32.totalorder %s1261_s14, %s1257_s13 }
  0x3b   : > { %s1473_s8 = scalar_select %p1761_p7, %s1261_s14, %s70_s28  }
  0x3c   : > { %p1478_p0 = por %p58_p6, %p1762_p12  ;;  %p83_p8 = scmp.ne.s32.totalorder %s1257_s13, %s1253_s12 }
  0x3d   : > { %p133_p10 = scmp.eq.s32.totalorder %s813_s5, 3  ;;  %p1764_p11 = scmp.eq.s32.totalorder %s1293_s22, 0 }
  0x3e   : > { %s1763_s26 = scalar_select %p1478_p0, 1, 0 }
  0x3f   : > { %p79_p13 = por %p77_p9, %p1764_p11  ;;  %p139_p1 = scmp.eq.s32.totalorder %s814_s6, 3 }
  0x40   : > { %p1488_p3 = por %p83_p8, %p58_p6  ;;  %p1492_p4 = por %p133_p10, %p77_p9 }
  0x41   : > { %p1496_p2 = por %p139_p1, %p83_p8  ;;  %s182_s10 = sand.u32 1, %s1261_s14  }
  0x42   : > { %s1765_s3 = scalar_select %p1488_p3, 1, 0 }
  0x43   : > { %s1766_s30 = scalar_select %p1492_p4, 1, 0 }
  0x44   : > { %s1767_s15 = scalar_select %p1496_p2, 1, 0 }
  0x45   : > { %s821_s25 = sshll.u32 %s182_s10, 7  ;;  %s854_s9 = sshll.u32 %s1289_s21, 11 }
  0x46   : > { %s1505_s27 = scalar_lea.hbm %s1743_s1, %s854_s9  ;;  %s186_s5 = scalar_lea.vmem [#allocation6], %s821_s25 }
  0x47   : > { %s193_s6 = sshll.u32 %s186_s5, 4  ;;  %p1768_p6 = scmp.lt.s32.totalorder %s1293_s22, 4  ;;  %s1507_s6 = int_to_ptr.vmem [resolvable:$true] %s193_s6 }
  0x48   : > { %s1515_s23 = scalar_lea.sflag [#allocation7], %s182_s10  ;;  %s1137_s11 = scalar_lea.hbm %s1505_s27, 2048 }
  0x49   : > { %p1511_p7 = pnand %p1768_p6, %p79_p13  ;;  %p1138_p12 = scmp.ne.s32.totalorder %s1505_s27, %s1137_s11 }
  0x4a   : > { %s1142_s29 = scalar_lea.hbm %s1743_s1, 4096  ;;  %p1143_p11 = scmp.lt.u32.totalorder %s1505_s27, %s1743_s1 }
  0x4b   : > { %p1139_p9 = pneg %p1511_p7  ;;  %p1144_p13 = scmp.lt.u32.totalorder %s1142_s29, %s1137_s11 }
  0x4c   : > { %p1146_p6 = scmp.lt.u32.totalorder %s1137_s11, %s1505_s27 }
  0x4d   : > { %p1140_p8 = pnand %p1139_p9, %p1138_p12  ;;  %p1145_p1 = por %p1144_p13, %p1143_p11 }
  0x4f   : > { %p1141_p10 = pneg %p1140_p8  ;;  %p1147_p2 = por %p1146_p6, %p1145_p1 }
  0x51   : > { %p1148_p4 = pnand %p1147_p2, %p1141_p10 }
  0x53   : > { %1151 = shalt.err (!%p1148_p4)
}
  0x54   : > { %s1152_s10 = scalar_lea.vmem %s1507_s6, 2048  ;;  %s1299_s25 = smov [#allocation6]  }
  0x55   : > { %p1153_p12 = scmp.ne.s32.totalorder %s1507_s6, %s1152_s10  ;;  %s1157_s9 = sshll.u32 %s1299_s25, 4  ;;  %s1158_s9 = int_to_ptr.vmem [resolvable:$false] %s1157_s9 }
  0x56   : > { %s1159_s0 = scalar_lea.vmem %s1158_s9, 4096  ;;  %p1160_p0 = scmp.lt.s32.totalorder %s1507_s6, %s1158_s9 }
  0x57   : > { %p1155_p8 = pnand %p1153_p12, %p1139_p9  ;;  %p1161_p11 = scmp.lt.s32.totalorder %s1159_s0, %s1152_s10 }
  0x59   : > { %p1156_p3 = pneg %p1155_p8  ;;  %p1162_p13 = por %p1161_p11, %p1160_p0 }
  0x5b   : > { %p1163_p1 = pnand %p1162_p13, %p1156_p3 }
  0x5d   : > { %1166 = shalt.err (!%p1163_p1)
}
  0x5e   : > { %s1300_s11 = smov 8   ;;  %s1770_s29 = smov 128  }
  0x5f   : > { %970 = dma.hbm_to_vmem [thread:$0]  (!%p1511_p7), %s1505_s27, 2048, %s1507_s6, %s1515_s23, %s1770_s29, %s1770_s29, %s1300_s11  }
  0x60   : > { %205 = sbr.rel (%p1463_p5) target bundleno = 478 (0x1de), region = 28  ;;  %s207_s5 = sand.u32 (!%p1463_p5), 1, %s1269_s16  }
  0x61   : > { %s825_s25 = sshll.u32 (!%p1463_p5), %s207_s5, 6  ;;  %s208_s10 = scalar_lea.sflag (!%p1463_p5), [#allocation4], %s207_s5 }
  0x62   : > { %s1548_s9 = scalar_lea.vmem (!%p1463_p5), [#allocation3], %s825_s25  ;;  %p1771_p0 = scmp.ne.s32.totalorder (!%p1463_p5), %s1763_s26, 0 }
  0x67   : > { %1240 = dma.done.wait (%p1771_p0), %s208_s10, 1024  }
  0x68   : > { %1242 = vsyncadd (%p1771_p0), %s208_s10, 4294966272  ;;  %s1555_s28 = sand.u32 1, %s1257_s13   ;;  %p1772_p5 = scmp.ne.s32.totalorder %s1765_s3, 0 }
  0x69   : > { %s826_s23 = sshll.u32 %s1555_s28, 7  ;;  %s217_s4 = scalar_lea.sflag [#allocation7], %s1555_s28 }
  0x6a   : > { %s1559_s27 = scalar_lea.vmem [#allocation6], %s826_s23 }
  0x6b   : > { %1244 = dma.done.wait (%p1772_p5), %s217_s4, 2048  }
  0x6c   : > { %1246 = vsyncadd (%p1772_p5), %s217_s4, 4294965248  ;;  %s827_s6 = sshll.u32 %s1555_s28, 6  ;;  %s828_s26 = sshll.u32 %s1281_s19, 4 }
  0x6d   : > { %p256_p3 = scmp.lt.s32.totalorder %s828_s26, 31  ;;  %s1572_s25 = scalar_lea.vmem [#allocation8], %s827_s6 }
  0x6e   : > { %p830_p4 = scmp.ne.s32.totalorder %s1277_s18, 0 }
  0x6f   : > { %s1794_s26 = smov (!%p256_p3, %s828_s26), 31  ;;  %vm266_vm0 = vcmask (!%p830_p4), 7168   ;;  %v1301_v0 = vmov (!%p830_p4), 0.0  }
  0x70   : > { %s829_s0 = sshll.u32 %s1794_s26, 3  ;;  %265 = sbr.rel (%p830_p4) target bundleno = 120 (0x78), region = 40  ;;  %267 = vst.msk [vmem:[#allocation2] sm:$0xff] (!%p830_p4), %vm266_vm0, %v1301_v0  ;;  %268 = vst.msk [vmem:[#allocation2 + $0x8] sm:$0xff] (!%p830_p4), %vm266_vm0, %v1301_v0 }
  0x71   : > { %s1570_s5 = scalar_lea.vmem %s1744_s2, %s829_s0  ;;  %269 = vst.msk [vmem:[#allocation2 + $0x10] sm:$0xff] (!%p830_p4), %vm266_vm0, %v1301_v0  ;;  %270 = vst.msk [vmem:[#allocation2 + $0x18] sm:$0xff] (!%p830_p4), %vm266_vm0, %v1301_v0 }
  0x72   : > { %271 = vst.msk [vmem:[#allocation2 + $0x20] sm:$0xff] (!%p830_p4), %vm266_vm0, %v1301_v0  ;;  %272 = vst.msk [vmem:[#allocation2 + $0x28] sm:$0xff] (!%p830_p4), %vm266_vm0, %v1301_v0 }
  0x73   : > { %273 = vst.msk [vmem:[#allocation2 + $0x30] sm:$0xff] (!%p830_p4), %vm266_vm0, %v1301_v0  ;;  %274 = vst.msk [vmem:[#allocation2 + $0x38] sm:$0xff] (!%p830_p4), %vm266_vm0, %v1301_v0 }
  0x74   : > { %275 = vst.msk [vmem:[#allocation2 + $0x40] sm:$0xff] (!%p830_p4), %vm266_vm0, %v1301_v0  ;;  %276 = vst.msk [vmem:[#allocation2 + $0x48] sm:$0xff] (!%p830_p4), %vm266_vm0, %v1301_v0 }
  0x75   : > { %277 = vst.msk [vmem:[#allocation2 + $0x50] sm:$0xff] (!%p830_p4), %vm266_vm0, %v1301_v0  ;;  %278 = vst.msk [vmem:[#allocation2 + $0x58] sm:$0xff] (!%p830_p4), %vm266_vm0, %v1301_v0 }
  0x76   : > { %279 = vst.msk [vmem:[#allocation2 + $0x60] sm:$0xff] (!%p830_p4), %vm266_vm0, %v1301_v0  ;;  %280 = vst.msk [vmem:[#allocation2 + $0x68] sm:$0xff] (!%p830_p4), %vm266_vm0, %v1301_v0 }
  0x77   : > { %281 = vst.msk [vmem:[#allocation2 + $0x70] sm:$0xff] %vm266_vm0, %v1301_v0  ;;  %282 = vst.msk [vmem:[#allocation2 + $0x78] sm:$0xff] %vm266_vm0, %v1301_v0 }
  0x78 PF: > { %v944_v1 = vld [vmem:[%s1548_s9 + $0x8] sm:$0xff]   ;;  %v873_v2 = vld [vmem:[%s1548_s9] sm:$0xff]   ;;  %v945_v7 = vld [vmem:[%s1548_s9 + $0x10] sm:$0xff]   ;;  %vm379_vm1 = vcmask 7168   ;;  %p831_p2 = scmp.ne.s32.totalorder %s1277_s18, 1 }
  0x79   : > { %v878_v3 = vunpack.c.l.bf16 %v944_v1  ;;  %v874_v4 = vunpack.c.l.bf16 %v873_v2  ;;  %v879_v5 = vunpack.c.h.bf16 %v944_v1  ;;  %v875_v6 = vunpack.c.h.bf16 %v873_v2  ;;  %v946_v10 = vld [vmem:[%s1548_s9 + $0x18] sm:$0xff]   ;;  %v947_v13 = vld [vmem:[%s1548_s9 + $0x20] sm:$0xff]   ;;  %v948_v16 = vld [vmem:[%s1548_s9 + $0x28] sm:$0xff]  }
  0x7a   : > { %v883_v8 = vunpack.c.h.bf16 %v945_v7  ;;  %v882_v9 = vunpack.c.l.bf16 %v945_v7  ;;  %v887_v11 = vunpack.c.h.bf16 %v946_v10  ;;  %v886_v12 = vunpack.c.l.bf16 %v946_v10  ;;  %v949_v19 = vld [vmem:[%s1548_s9 + $0x30] sm:$0xff]   ;;  %v950_v22 = vld [vmem:[%s1548_s9 + $0x38] sm:$0xff]   ;;  %v283_v26 = vld [vmem:[#allocation2] sm:$0xff] }
  0x7b   : > { %335 = vadd.xlane.f32.xlu1 %v878_v3  ;;  %331 = vadd.xlane.f32.xlu0 %v874_v4  ;;  %v891_v14 = vunpack.c.h.bf16 %v947_v13  ;;  %v890_v15 = vunpack.c.l.bf16 %v947_v13  ;;  %v895_v17 = vunpack.c.h.bf16 %v948_v16  ;;  %v894_v18 = vunpack.c.l.bf16 %v948_v16  ;;  %v285_v25 = vld [vmem:[#allocation2 + $0x10] sm:$0xff]  ;;  %v286_v31 = vld [vmem:[#allocation2 + $0x18] sm:$0xff]  ;;  %v284_v32 = vld [vmem:[#allocation2 + $0x8] sm:$0xff] }
  0x7c   : > { %v899_v20 = vunpack.c.h.bf16 %v949_v19  ;;  %v898_v21 = vunpack.c.l.bf16 %v949_v19  ;;  %v903_v23 = vunpack.c.h.bf16 %v950_v22  ;;  %v902_v24 = vunpack.c.l.bf16 %v950_v22  ;;  %v288_v37 = vld [vmem:[#allocation2 + $0x28] sm:$0xff]  ;;  %v287_v38 = vld [vmem:[#allocation2 + $0x20] sm:$0xff]  ;;  %v290_v43 = vld [vmem:[#allocation2 + $0x38] sm:$0xff] }
  0x7d   : > { %v289_v44 = vld [vmem:[#allocation2 + $0x30] sm:$0xff]  ;;  %v292_v49 = vld [vmem:[#allocation2 + $0x48] sm:$0xff]  ;;  %v291_v50 = vld [vmem:[#allocation2 + $0x40] sm:$0xff] }
  0x7e   : > { %v294_v55 = vld [vmem:[#allocation2 + $0x58] sm:$0xff]  ;;  %v293_v56 = vld [vmem:[#allocation2 + $0x50] sm:$0xff]  ;;  %v296_v61 = vld [vmem:[#allocation2 + $0x68] sm:$0xff] }
  0x7f   : > { %337 = vadd.xlane.f32.xlu1 %v879_v5  ;;  %333 = vadd.xlane.f32.xlu0 %v875_v6  ;;  %v295_v62 = vld [vmem:[#allocation2 + $0x60] sm:$0xff]  ;;  %v298_v3 = vld [vmem:[#allocation2 + $0x78] sm:$0xff]  ;;  %v297_v4 = vld [vmem:[#allocation2 + $0x70] sm:$0xff] }
  0x83   : > { %341 = vadd.xlane.f32.xlu1 %v883_v8  ;;  %339 = vadd.xlane.f32.xlu0 %v882_v9 }
  0x87   : > { %345 = vadd.xlane.f32.xlu1 %v887_v11  ;;  %343 = vadd.xlane.f32.xlu0 %v886_v12  ;;  %v1302_v12 = vmov (!%p831_p2), 0  }
  0x88   : > { %1074 = vset.pattern.permute.xlu1 (!%p831_p2), %v1302_v12  ;;  %1073 = vset.pattern.permute.xlu0 (!%p831_p2), %v1302_v12 }
  0x8b   : > { %349 = vadd.xlane.f32.xlu1 %v891_v14  ;;  %347 = vadd.xlane.f32.xlu0 %v890_v15 }
  0x8f   : > { %353 = vadd.xlane.f32.xlu1 %v895_v17  ;;  %351 = vadd.xlane.f32.xlu0 %v894_v18 }
  0x93   : > { %357 = vadd.xlane.f32.xlu1 %v899_v20  ;;  %355 = vadd.xlane.f32.xlu0 %v898_v21 }
  0x97   : > { %361 = vadd.xlane.f32.xlu1 %v903_v23  ;;  %359 = vadd.xlane.f32.xlu0 %v902_v24 }
 0x108   : > { %v336_v27 = vpop.xlane.xlu1 %335  ;;  %v332_v28 = vpop.xlane.xlu0 %331 }
 0x109   : > { %v365_v29 = vadd.f32 %v336_v27, %v285_v25  ;;  %v363_v30 = vadd.f32 %v332_v28, %v283_v26 }
 0x10b   : > { %382 = vst.msk [vmem:[#allocation2 + $0x10] sm:$0xff] %vm379_vm1, %v365_v29  ;;  %380 = vst.msk [vmem:[#allocation2] sm:$0xff] %vm379_vm1, %v363_v30 }
 0x10c   : > { %v338_v33 = vpop.xlane.xlu1 %337  ;;  %v334_v34 = vpop.xlane.xlu0 %333 }
 0x10d   : > { %v366_v35 = vadd.f32 %v338_v33, %v286_v31  ;;  %v364_v36 = vadd.f32 %v334_v34, %v284_v32 }
 0x10f   : > { %383 = vst.msk [vmem:[#allocation2 + $0x18] sm:$0xff] %vm379_vm1, %v366_v35  ;;  %381 = vst.msk [vmem:[#allocation2 + $0x8] sm:$0xff] %vm379_vm1, %v364_v36 }
 0x110   : > { %v342_v39 = vpop.xlane.xlu1 %341  ;;  %v340_v40 = vpop.xlane.xlu0 %339 }
 0x111   : > { %v368_v41 = vadd.f32 %v342_v39, %v288_v37  ;;  %v367_v42 = vadd.f32 %v340_v40, %v287_v38 }
 0x112   : > { %v402_v9 = vld [vmem:[#allocation2 + $0x10] sm:$0xff] (!%p831_p2)  ;;  %v400_v10 = vld [vmem:[#allocation2] sm:$0xff] (!%p831_p2) }
 0x113   : > { %385 = vst.msk [vmem:[#allocation2 + $0x28] sm:$0xff] %vm379_vm1, %v368_v41  ;;  %384 = vst.msk [vmem:[#allocation2 + $0x20] sm:$0xff] %vm379_vm1, %v367_v42  ;;  %v418_v13 = vmax.f32 (!%p831_p2), %v402_v9, 1.0  ;;  %v416_v14 = vmax.f32 (!%p831_p2), %v400_v10, 1.0 }
 0x114   : > { %v346_v45 = vpop.xlane.xlu1 %345  ;;  %v344_v46 = vpop.xlane.xlu0 %343 }
 0x115   : > { %v370_v47 = vadd.f32 %v346_v45, %v290_v43  ;;  %v369_v48 = vadd.f32 %v344_v46, %v289_v44  ;;  %1075 = vrsqrt.f32 (!%p831_p2), %v418_v13 }
 0x116   : > { %v403_v11 = vld [vmem:[#allocation2 + $0x18] sm:$0xff] (!%p831_p2)  ;;  %v401_v16 = vld [vmem:[#allocation2 + $0x8] sm:$0xff] (!%p831_p2)  ;;  %1077 = vrsqrt.f32 (!%p831_p2), %v416_v14 }
 0x117   : > { %387 = vst.msk [vmem:[#allocation2 + $0x38] sm:$0xff] %vm379_vm1, %v370_v47  ;;  %386 = vst.msk [vmem:[#allocation2 + $0x30] sm:$0xff] %vm379_vm1, %v369_v48  ;;  %v419_v15 = vmax.f32 (!%p831_p2), %v403_v11, 1.0  ;;  %v417_v19 = vmax.f32 (!%p831_p2), %v401_v16, 1.0  ;;  %v471_v14 = vld [vmem:[%s1559_s27 + $0x38] sm:$0xff] (!%p831_p2) }
 0x118   : > { %v350_v51 = vpop.xlane.xlu1 %349  ;;  %v348_v52 = vpop.xlane.xlu0 %347 }
 0x119   : > { %v372_v53 = vadd.f32 %v350_v51, %v292_v49  ;;  %v371_v54 = vadd.f32 %v348_v52, %v291_v50  ;;  %1079 = vrsqrt.f32 (!%p831_p2), %v419_v15  ;;  %v470_v15 = vld [vmem:[%s1559_s27 + $0x30] sm:$0xff] (!%p831_p2) }
 0x11a   : > { %v405_v17 = vld [vmem:[#allocation2 + $0x28] sm:$0xff] (!%p831_p2)  ;;  %v404_v18 = vld [vmem:[#allocation2 + $0x20] sm:$0xff] (!%p831_p2)  ;;  %1081 = vrsqrt.f32 (!%p831_p2), %v417_v19 }
 0x11b   : > { %389 = vst.msk [vmem:[#allocation2 + $0x48] sm:$0xff] %vm379_vm1, %v372_v53  ;;  %388 = vst.msk [vmem:[#allocation2 + $0x40] sm:$0xff] %vm379_vm1, %v371_v54  ;;  %v421_v21 = vmax.f32 (!%p831_p2), %v405_v17, 1.0  ;;  %v420_v23 = vmax.f32 (!%p831_p2), %v404_v18, 1.0 }
 0x11c   : > { %v354_v57 = vpop.xlane.xlu1 %353  ;;  %v352_v58 = vpop.xlane.xlu0 %351 }
 0x11d   : > { %v374_v59 = vadd.f32 %v354_v57, %v294_v55  ;;  %v373_v60 = vadd.f32 %v352_v58, %v293_v56  ;;  %1083 = vrsqrt.f32 (!%p831_p2), %v421_v21  ;;  %v473_v21 = vld [vmem:[%s1559_s27 + $0x48] sm:$0xff] (!%p831_p2) }
 0x11e   : > { %v407_v20 = vld [vmem:[#allocation2 + $0x38] sm:$0xff] (!%p831_p2)  ;;  %v406_v22 = vld [vmem:[#allocation2 + $0x30] sm:$0xff] (!%p831_p2)  ;;  %1085 = vrsqrt.f32 (!%p831_p2), %v420_v23 }
 0x11f   : > { %391 = vst.msk [vmem:[#allocation2 + $0x58] sm:$0xff] %vm379_vm1, %v374_v59  ;;  %390 = vst.msk [vmem:[#allocation2 + $0x50] sm:$0xff] %vm379_vm1, %v373_v60  ;;  %v423_v25 = vmax.f32 (!%p831_p2), %v407_v20, 1.0  ;;  %v422_v27 = vmax.f32 (!%p831_p2), %v406_v22, 1.0  ;;  %v1076_v40 = vpop.eup (!%p831_p2), %1075  ;;  %v466_v60 = vld [vmem:[%s1559_s27 + $0x10] sm:$0xff] (!%p831_p2)  ;;  %v472_v22 = vld [vmem:[%s1559_s27 + $0x40] sm:$0xff] (!%p831_p2) }
 0x120   : > { %v358_v63 = vpop.xlane.xlu1 %357  ;;  %v356_v0 = vpop.xlane.xlu0 %355  ;;  %492 = vperm.xlu1 (!%p831_p2), %1074, %v1076_v40   ;;  %450 = vst.msk [vmem:[%s1570_s5 + $0x10] sm:$0xff] (!%p831_p2), %vm379_vm1, %v1076_v40 }
 0x121   : > { %v376_v1 = vadd.f32 %v358_v63, %v296_v61  ;;  %v375_v2 = vadd.f32 %v356_v0, %v295_v62  ;;  %399 = sbr.rel (%p831_p2) target bundleno = 451 (0x1c3), region = 44  ;;  %1087 = vrsqrt.f32 (!%p831_p2), %v423_v25  ;;  %v1078_v42 = vpop.eup (!%p831_p2), %1077  ;;  %v467_v61 = vld [vmem:[%s1559_s27 + $0x18] sm:$0xff] (!%p831_p2)  ;;  %v464_v62 = vld [vmem:[%s1559_s27] sm:$0xff] (!%p831_p2)  ;;  %v465_v63 = vld [vmem:[%s1559_s27 + $0x8] sm:$0xff] (!%p831_p2) }
 0x122   : > { %v409_v24 = vld [vmem:[#allocation2 + $0x48] sm:$0xff] (!%p831_p2)  ;;  %v408_v26 = vld [vmem:[#allocation2 + $0x40] sm:$0xff] (!%p831_p2)  ;;  %1089 = vrsqrt.f32 (!%p831_p2), %v422_v27  ;;  %482 = vperm.xlu0 (!%p831_p2), %1073, %v1078_v42   ;;  %448 = vst.msk [vmem:[%s1570_s5] sm:$0xff] (!%p831_p2), %vm379_vm1, %v1078_v42  ;;  %v479_v42 = vld [vmem:[%s1559_s27 + $0x78] sm:$0xff] (!%p831_p2) }
 0x123   : > { %393 = vst.msk [vmem:[#allocation2 + $0x68] sm:$0xff] %vm379_vm1, %v376_v1  ;;  %392 = vst.msk [vmem:[#allocation2 + $0x60] sm:$0xff] %vm379_vm1, %v375_v2  ;;  %v425_v29 = vmax.f32 (!%p831_p2), %v409_v24, 1.0  ;;  %v424_v31 = vmax.f32 (!%p831_p2), %v408_v26, 1.0  ;;  %v1080_v44 = vpop.eup (!%p831_p2), %1079 }
 0x124   : > { %v362_v5 = vpop.xlane.xlu1 %361  ;;  %v360_v6 = vpop.xlane.xlu0 %359  ;;  %451 = vst.msk [vmem:[%s1570_s5 + $0x18] sm:$0xff] (!%p831_p2), %vm379_vm1, %v1080_v44  ;;  %497 = vperm.xlu1 (!%p831_p2), %1074, %v1080_v44  }
 0x125   : > { %v378_v7 = vadd.f32 %v362_v5, %v298_v3  ;;  %v377_v8 = vadd.f32 %v360_v6, %v297_v4  ;;  %1091 = vrsqrt.f32 (!%p831_p2), %v425_v29  ;;  %v1082_v45 = vpop.eup (!%p831_p2), %1081  ;;  %v469_v6 = vld [vmem:[%s1559_s27 + $0x28] sm:$0xff] (!%p831_p2)  ;;  %v474_v29 = vld [vmem:[%s1559_s27 + $0x50] sm:$0xff] (!%p831_p2) }
 0x126   : > { %v411_v28 = vld [vmem:[#allocation2 + $0x58] sm:$0xff] (!%p831_p2)  ;;  %v410_v30 = vld [vmem:[#allocation2 + $0x50] sm:$0xff] (!%p831_p2)  ;;  %1093 = vrsqrt.f32 (!%p831_p2), %v424_v31  ;;  %449 = vst.msk [vmem:[%s1570_s5 + $0x8] sm:$0xff] (!%p831_p2), %vm379_vm1, %v1082_v45  ;;  %487 = vperm.xlu0 (!%p831_p2), %1073, %v1082_v45  }
 0x127   : > { %395 = vst.msk [vmem:[#allocation2 + $0x78] sm:$0xff] %vm379_vm1, %v378_v7  ;;  %394 = vst.msk [vmem:[#allocation2 + $0x70] sm:$0xff] %vm379_vm1, %v377_v8  ;;  %v427_v33 = vmax.f32 (!%p831_p2), %v411_v28, 1.0  ;;  %v426_v35 = vmax.f32 (!%p831_p2), %v410_v30, 1.0  ;;  %v1084_v46 = vpop.eup (!%p831_p2), %1083  ;;  %v468_v8 = vld [vmem:[%s1559_s27 + $0x20] sm:$0xff] (!%p831_p2)  ;;  %v475_v28 = vld [vmem:[%s1559_s27 + $0x58] sm:$0xff] (!%p831_p2) }
 0x128   : > { %v1086_v47 = vpop.eup %1085  ;;  %453 = vst.msk [vmem:[%s1570_s5 + $0x28] sm:$0xff] %vm379_vm1, %v1084_v46  ;;  %507 = vperm.xlu1 %1074, %v1084_v46  }
 0x129   : > { %1095 = vrsqrt.f32 %v427_v33  ;;  %452 = vst.msk [vmem:[%s1570_s5 + $0x20] sm:$0xff] %vm379_vm1, %v1086_v47 }
 0x12a   : > { %v413_v32 = vld [vmem:[#allocation2 + $0x68] sm:$0xff]  ;;  %v412_v34 = vld [vmem:[#allocation2 + $0x60] sm:$0xff]  ;;  %1097 = vrsqrt.f32 %v426_v35  ;;  %502 = vperm.xlu0 %1073, %v1086_v47  }
 0x12b   : > { %v429_v37 = vmax.f32 %v413_v32, 1.0  ;;  %v428_v39 = vmax.f32 %v412_v34, 1.0  ;;  %v1088_v48 = vpop.eup %1087  ;;  %v477_v35 = vld [vmem:[%s1559_s27 + $0x68] sm:$0xff] }
 0x12c   : > { %v1090_v49 = vpop.eup %1089  ;;  %455 = vst.msk [vmem:[%s1570_s5 + $0x38] sm:$0xff] %vm379_vm1, %v1088_v48  ;;  %517 = vperm.xlu1 %1074, %v1088_v48  }
 0x12d   : > { %1099 = vrsqrt.f32 %v429_v37  ;;  %454 = vst.msk [vmem:[%s1570_s5 + $0x30] sm:$0xff] %vm379_vm1, %v1090_v49 }
 0x12e   : > { %v415_v36 = vld [vmem:[#allocation2 + $0x78] sm:$0xff]  ;;  %v414_v38 = vld [vmem:[#allocation2 + $0x70] sm:$0xff]  ;;  %1101 = vrsqrt.f32 %v428_v39  ;;  %512 = vperm.xlu0 %1073, %v1090_v49  }
 0x12f   : > { %v431_v41 = vmax.f32 %v415_v36, 1.0  ;;  %v430_v43 = vmax.f32 %v414_v38, 1.0  ;;  %v1092_v50 = vpop.eup %1091  ;;  %v476_v36 = vld [vmem:[%s1559_s27 + $0x60] sm:$0xff] }
 0x130   : > { %v1094_v51 = vpop.eup %1093  ;;  %457 = vst.msk [vmem:[%s1570_s5 + $0x48] sm:$0xff] %vm379_vm1, %v1092_v50  ;;  %527 = vperm.xlu1 %1074, %v1092_v50  }
 0x131   : > { %1103 = vrsqrt.f32 %v431_v41  ;;  %456 = vst.msk [vmem:[%s1570_s5 + $0x40] sm:$0xff] %vm379_vm1, %v1094_v51 }
 0x132   : > { %1105 = vrsqrt.f32 %v430_v43  ;;  %522 = vperm.xlu0 %1073, %v1094_v51   ;;  %v478_v43 = vld [vmem:[%s1559_s27 + $0x70] sm:$0xff] }
 0x133   : > { %v1096_v52 = vpop.eup %1095 }
 0x134   : > { %v1098_v53 = vpop.eup %1097  ;;  %459 = vst.msk [vmem:[%s1570_s5 + $0x58] sm:$0xff] %vm379_vm1, %v1096_v52  ;;  %537 = vperm.xlu1 %1074, %v1096_v52  }
 0x135   : > { %458 = vst.msk [vmem:[%s1570_s5 + $0x50] sm:$0xff] %vm379_vm1, %v1098_v53 }
 0x136   : > { %532 = vperm.xlu0 %1073, %v1098_v53  }
 0x137   : > { %v1100_v54 = vpop.eup %1099 }
 0x138   : > { %v1102_v55 = vpop.eup %1101  ;;  %461 = vst.msk [vmem:[%s1570_s5 + $0x68] sm:$0xff] %vm379_vm1, %v1100_v54  ;;  %547 = vperm.xlu1 %1074, %v1100_v54  }
 0x139   : > { %460 = vst.msk [vmem:[%s1570_s5 + $0x60] sm:$0xff] %vm379_vm1, %v1102_v55 }
 0x13a   : > { %542 = vperm.xlu0 %1073, %v1102_v55  }
 0x13b   : > { %v1104_v56 = vpop.eup %1103 }
 0x13c   : > { %v1106_v57 = vpop.eup %1105  ;;  %463 = vst.msk [vmem:[%s1570_s5 + $0x78] sm:$0xff] %vm379_vm1, %v1104_v56  ;;  %557 = vperm.xlu1 %1074, %v1104_v56  }
 0x13d   : > { %462 = vst.msk [vmem:[%s1570_s5 + $0x70] sm:$0xff] %vm379_vm1, %v1106_v57 }
 0x13e   : > { %552 = vperm.xlu0 %1073, %v1106_v57  }
 0x19f   : > { %v493_v58 = vpop.permute.xlu1 %492 }
 0x1a0   : > { %v562_v1 = vmul.f32 %v493_v58, %v466_v60 }
 0x1a1   : > { %v483_v59 = vpop.permute.xlu0 %482 }
 0x1a2   : > { %v560_v4 = vmul.f32 %v483_v59, %v464_v62 }
 0x1a3   : > { %v498_v0 = vpop.permute.xlu1 %497 }
 0x1a4   : > { %v563_v2 = vmul.f32 %v498_v0, %v467_v61 }
 0x1a5   : > { %v488_v3 = vpop.permute.xlu0 %487 }
 0x1a6   : > { %v561_v5 = vmul.f32 %v488_v3, %v465_v63  ;;  %v912_v7 = vpack.c.bf16 %v563_v2, %v562_v1 }
 0x1a7   : > { %v508_v10 = vpop.permute.xlu1 %507 }
 0x1a8   : > { %v907_v9 = vpack.c.bf16 %v561_v5, %v560_v4  ;;  %951 = vst [vmem:[%s1572_s25 + $0x8] sm:$0xff] %v912_v7   ;;  %v565_v11 = vmul.f32 %v508_v10, %v469_v6 }
 0x1a9   : > { %v503_v12 = vpop.permute.xlu0 %502 }
 0x1aa   : > { %908 = vst [vmem:[%s1572_s25] sm:$0xff] %v907_v9   ;;  %v564_v13 = vmul.f32 %v503_v12, %v468_v8 }
 0x1ab   : > { %v518_v17 = vpop.permute.xlu1 %517 }
 0x1ac   : > { %v917_v16 = vpack.c.bf16 %v565_v11, %v564_v13  ;;  %v567_v18 = vmul.f32 %v518_v17, %v471_v14 }
 0x1ad   : > { %v513_v19 = vpop.permute.xlu0 %512 }
 0x1ae   : > { %952 = vst [vmem:[%s1572_s25 + $0x10] sm:$0xff] %v917_v16   ;;  %v566_v20 = vmul.f32 %v513_v19, %v470_v15 }
 0x1af   : > { %v528_v24 = vpop.permute.xlu1 %527 }
 0x1b0   : > { %v922_v23 = vpack.c.bf16 %v567_v18, %v566_v20  ;;  %v569_v25 = vmul.f32 %v528_v24, %v473_v21 }
 0x1b1   : > { %v523_v26 = vpop.permute.xlu0 %522 }
 0x1b2   : > { %953 = vst [vmem:[%s1572_s25 + $0x18] sm:$0xff] %v922_v23   ;;  %v568_v27 = vmul.f32 %v523_v26, %v472_v22 }
 0x1b3   : > { %v538_v31 = vpop.permute.xlu1 %537 }
 0x1b4   : > { %v927_v30 = vpack.c.bf16 %v569_v25, %v568_v27  ;;  %v571_v32 = vmul.f32 %v538_v31, %v475_v28 }
 0x1b5   : > { %v533_v33 = vpop.permute.xlu0 %532 }
 0x1b6   : > { %954 = vst [vmem:[%s1572_s25 + $0x20] sm:$0xff] %v927_v30   ;;  %v570_v34 = vmul.f32 %v533_v33, %v474_v29 }
 0x1b7   : > { %v548_v38 = vpop.permute.xlu1 %547 }
 0x1b8   : > { %v932_v37 = vpack.c.bf16 %v571_v32, %v570_v34  ;;  %v573_v39 = vmul.f32 %v548_v38, %v477_v35 }
 0x1b9   : > { %v543_v40 = vpop.permute.xlu0 %542 }
 0x1ba   : > { %955 = vst [vmem:[%s1572_s25 + $0x28] sm:$0xff] %v932_v37   ;;  %v572_v41 = vmul.f32 %v543_v40, %v476_v36 }
 0x1bb   : > { %v558_v45 = vpop.permute.xlu1 %557 }
 0x1bc   : > { %v937_v44 = vpack.c.bf16 %v573_v39, %v572_v41  ;;  %v575_v46 = vmul.f32 %v558_v45, %v479_v42 }
 0x1bd   : > { %v553_v47 = vpop.permute.xlu0 %552 }
 0x1be   : > { %956 = vst [vmem:[%s1572_s25 + $0x30] sm:$0xff] %v937_v44   ;;  %v574_v48 = vmul.f32 %v553_v47, %v478_v43 }
 0x1c0   : > { %v942_v49 = vpack.c.bf16 %v575_v46, %v574_v48 }
 0x1c2   : > { %957 = vst [vmem:[%s1572_s25 + $0x38] sm:$0xff] %v942_v49  }
 0x1c3 PF: > { %s871_s18 = sshll.u32 %s1281_s19, 10  ;;  %s1773_s9 = sld [smem:[#allocation14_spill]] }
 0x1c4   : > { %s679_s4 = sshll.u32 %s1572_s25, 4  ;;  %s662_s27 = scalar_lea.sflag [#allocation5], %s1555_s28  ;;  %s1679_s4 = int_to_ptr.vmem [resolvable:$true] %s679_s4 }
 0x1c5   : > { %s1167_s6 = scalar_lea.vmem %s1679_s4, 1024  ;;  %p1774_p9 = scmp.ne.s32.totalorder %s1766_s30, 0 }
 0x1c6   : > { %p1168_p7 = scmp.ne.s32.totalorder %s1679_s4, %s1167_s6  ;;  %s1303_s26 = smov [#allocation8]  }
 0x1c7   : > { %s1171_s0 = sshll.u32 %s1303_s26, 4  ;;  %s1172_s0 = int_to_ptr.vmem [resolvable:$false] %s1171_s0 }
 0x1c8   : > { %p1169_p10 = pnand %p1168_p7, %p1774_p9  ;;  %s1173_s19 = scalar_lea.vmem %s1172_s0, 2048 }
 0x1c9   : > { %s1676_s23 = scalar_lea.hbm %s1773_s9, %s871_s18  ;;  %p1174_p12 = scmp.lt.s32.totalorder %s1679_s4, %s1172_s0 }
 0x1ca   : > { %p1170_p6 = pneg %p1169_p10  ;;  %p1175_p8 = scmp.lt.s32.totalorder %s1173_s19, %s1167_s6 }
 0x1cc   : > { %p1176_p11 = por %p1175_p8, %p1174_p12 }
 0x1ce   : > { %p1177_p13 = pnand %p1176_p11, %p1170_p6 }
 0x1d0   : > { %1180 = shalt.err (!%p1177_p13)
}
 0x1d1   : > { %s1181_s11 = scalar_lea.hbm %s1676_s23, 1024  ;;  %s1185_s25 = scalar_lea.hbm %s1773_s9, 2048 }
 0x1d2   : > { %p1182_p1 = scmp.ne.s32.totalorder %s1676_s23, %s1181_s11  ;;  %p1186_p3 = scmp.lt.u32.totalorder %s1676_s23, %s1773_s9 }
 0x1d3   : > { %p1187_p4 = scmp.lt.u32.totalorder %s1185_s25, %s1181_s11  ;;  %p1189_p7 = scmp.lt.u32.totalorder %s1181_s11, %s1676_s23 }
 0x1d4   : > { %p1183_p0 = pnand %p1182_p1, %p1774_p9 }
 0x1d5   : > { %p1188_p2 = por %p1187_p4, %p1186_p3 }
 0x1d6   : > { %p1184_p5 = pneg %p1183_p0 }
 0x1d7   : > { %p1190_p10 = por %p1189_p7, %p1188_p2 }
 0x1d9   : > { %p1191_p6 = pnand %p1190_p10, %p1184_p5 }
 0x1db   : > { %1194 = shalt.err (!%p1191_p6)
}
 0x1dc   : > { %s1304_s10 = smov 64   ;;  %s1305_s6 = smov 4  }
 0x1dd   : > { %962 = dma.vmem_to_hbm [thread:$0]  (%p1774_p9), %s1679_s4, 1024, %s1676_s23, %s662_s27, %s1304_s10, %s1304_s10, %s1305_s6  }
 0x1de PF: > { %p976_p12 = scmp.ge.s32.totalorder %s1293_s22, 2  ;;  %s702_s26 = sand.u32 1, %s1253_s12  }
 0x1df   : > { %p1775_p8 = scmp.ne.s32.totalorder %s1767_s15, 0  ;;  %s703_s0 = scalar_lea.sflag [#allocation5], %s702_s26 }
 0x1e1   : > { %p972_p11 = pnand %p976_p12, %p1775_p8 }
 0x1e3   : > { %1248 = dma.done.wait (!%p972_p11), %s703_s0, 1024  }
 0x1e4   : > { %1250 = vsyncadd (!%p972_p11), %s703_s0, 4294966272  ;;  %s23_s22 = sadd.s32 1, %s1293_s22   ;;  %s1776_s30 = sld [smem:[#allocation12_spill]] }
 0x1e5   : > { %p20_p13 = scmp.ge.s32.totalorder %s23_s22, 6   ;;  %s1777_s12 = smov %s1257_s13 }
 0x1e6   : > { %s1778_s13 = smov %s1261_s14  ;;  %s1779_s14 = smov %s1473_s8 }
 0x1e7   : > { %s1780_s15 = smov %s1269_s16  ;;  %s1781_s16 = smov %s1273_s17 }
 0x1e8   : > { %s1782_s17 = smov %s1413_s7  ;;  %s1783_s18 = smov %s1285_s20 }
 0x1e9   : > { %s1784_s19 = smov %s1289_s21  ;;  %s1786_s21 = smov %s1792_s24 }
 0x1ea   : > { %s1785_s20 = smov %s1776_s30  ;;  %22 = sbr.rel (!%p20_p13) target bundleno = 14 (0xe), region = 106 }
 0x1f1   :  { %708 = vsyncpa [#allocation4], 1 }
 0x1f2   :  { %710 = vsyncpa [#allocation4 + $0x1], 1 }
 0x1f3   :  { %711 = vsyncpa [#allocation7], 1 }
 0x1f4   :  { %713 = vsyncpa [#allocation7 + $0x1], 1 }
 0x1f5   :  { %714 = vsyncpa [#allocation5], 1 }
 0x1f6   :  { %716 = vsyncpa [#allocation5 + $0x1], 1 }

</bundles_post_ra>
